<compile_context>
chip_gen: v5e
topology: v5e:2x2
jax: 0.10.0
libtpu: 0.0.40
codegen_flags: <defaults>
</compile_context>

<pallas_src>
import functools

import numpy as np
import jax
import jax.numpy as jnp
from jax import lax
from jax.experimental import pallas as pl
from jax.experimental.pallas import tpu as pltpu


# ----------------------------------------------------------------------------
# generation-aware VMEM budgeting + tiling helpers
# ----------------------------------------------------------------------------
def _vmem_caps():
    """(tile_working_set_budget_bytes, vmem_limit_bytes) sized off the chip
    (64 MiB VMEM per core on v7x, 128 MiB on v5e/v6e)."""
    cap = 64 << 20                                    # conservative fallback
    try:
        info = pltpu.get_tpu_info()
        cap = int(getattr(info, "vmem_capacity_bytes", cap) or cap)
    except Exception:
        pass
    tile_cap = max(4 << 20, int(cap * 0.30))          # per-kernel tile budget
    vmem_limit = max(32 << 20, min(int(cap * 3 // 4), 100 << 20))
    return tile_cap, vmem_limit


def _cparams(sem, vmem_limit_bytes=None):
    kw = dict(dimension_semantics=sem)
    if vmem_limit_bytes is not None:
        kw["vmem_limit_bytes"] = int(vmem_limit_bytes)
    return pltpu.CompilerParams(**kw)


def _pick_m_tile(M, C, DR, cap_bytes):
    """Largest lane tile (multiple of 128 dividing M) whose double-buffered
    working set fits the budget; full M when M isn't a 128-multiple (the only
    layout-legal choice then)."""
    if M % 128 != 0:
        return M
    def need(mt):   # 2x (C,mt) in + 2x (DR,mt) out + weight + stats, f32
        return 4 * (2 * (C + DR) * mt + DR * C + 8 * DR)
    best = 128
    for mt in range(128, M + 1, 128):
        if M % mt == 0 and need(mt) <= cap_bytes:
            best = mt
    return best


def _pick_batch_tile(B, M, D, cap_bytes):
    """Batch tile for the pooling kernel.  (Bt, D, M) blocks are always legal
    (last two dims full extent), so Bt is picked on VMEM budget alone; capped at
    B//2 so the grid has >= 2 steps (v7x megacore + pipelining everywhere)."""
    limit = max(1, B // 2)
    best = 1
    for bt in range(1, limit + 1):
        if B % bt != 0:
            continue
        need = 4 * bt * (2 * D * M + 4 * D * D)   # dbl-buffered in/out + temps, f32
        if need <= cap_bytes:
            best = bt
    return best


# ----------------------------------------------------------------------------
# Kernel 1: 1x1 conv (one MXU matmul per tile) + per-batch BatchNorm statistics.
#   grid = (B "parallel", M-tiles "arbitrary"); stats accumulate over the
#   M-tile axis only, so batch sharding across TensorCores stays correct.
# ----------------------------------------------------------------------------
def _conv_stats_kernel(x_ref, w_ref, y_ref, sum_ref, ssq_ref):
    # x_ref: (C, Mt)   w_ref: (DR, C)   y_ref: (DR, Mt)
    # sum_ref / ssq_ref: (DR, 1) per-batch accumulators (resident across M-tiles)
    @pl.when(pl.program_id(1) == 0)
    def _():
        sum_ref[...] = jnp.zeros_like(sum_ref)
        ssq_ref[...] = jnp.zeros_like(ssq_ref)

    y = jnp.dot(w_ref[...], x_ref[...], preferred_element_type=jnp.float32)
    y_ref[...] = y                                          # written exactly once
    sum_ref[...] += jnp.sum(y, axis=1, keepdims=True)       # per-channel sum
    ssq_ref[...] += jnp.sum(y * y, axis=1, keepdims=True)   # per-channel sum sq


def conv1x1_with_stats(x3, w, *, tile_cap_bytes, vmem_limit_bytes):
    """x3: (B, C, M), w: (DR, C).  Returns y (B, DR, M) plus per-batch
    per-channel sum / sumsq of shape (B, DR, 1)."""
    B, C, M = x3.shape
    DR = w.shape[0]
    Mt = _pick_m_tile(M, C, DR, tile_cap_bytes)
    grid = (B, M // Mt)
    return pl.pallas_call(
        _conv_stats_kernel,
        out_shape=(jax.ShapeDtypeStruct((B, DR, M), jnp.float32),
                   jax.ShapeDtypeStruct((B, DR, 1), jnp.float32),
                   jax.ShapeDtypeStruct((B, DR, 1), jnp.float32)),
        grid=grid,
        in_specs=[
            pl.BlockSpec((pl.Squeezed(), C, Mt), lambda b, m: (b, 0, m)),
            pl.BlockSpec((DR, C), lambda b, m: (0, 0)),
        ],
        out_specs=(
            pl.BlockSpec((pl.Squeezed(), DR, Mt), lambda b, m: (b, 0, m)),
            pl.BlockSpec((pl.Squeezed(), DR, 1), lambda b, m: (b, 0, 0)),
            pl.BlockSpec((pl.Squeezed(), DR, 1), lambda b, m: (b, 0, 0)),
        ),
        compiler_params=_cparams(("parallel", "arbitrary"), vmem_limit_bytes),
    )(x3, w)


# ----------------------------------------------------------------------------
# Kernel 2: fused BatchNorm-apply + activation + BDCovpool, batched over Bt.
#   dcov[i,j] = sqrt(exp(t) * max(d_i + d_j - 2*xp[i,j], 0) + 1e-5)
#   out      = dcov - rowmean - colmean + totalmean   (double centering)
# ----------------------------------------------------------------------------
def _bdc_pool_kernel(expt_ref, scale_ref, shift_ref, y_ref, out_ref, *,
                     apply_affine, act):
    # expt_ref: (1, 1) SMEM scalar (pre-computed exp(temperature))
    # scale_ref / shift_ref: (D, 1) fused BN affine; y_ref: (Bt, D, M)
    # out_ref: (Bt, D, D)
    Bt, D, _ = out_ref.shape
    exp_t = expt_ref[0, 0]                                  # scalar, no vector exp

    yb = y_ref[...]                                         # (Bt, D, M)
    if apply_affine:
        scale = scale_ref[...][None, :, :]                  # hoisted once
        shift = shift_ref[...][None, :, :]
        yb = yb * scale + shift
        if act == "leaky_relu":
            yb = jnp.maximum(yb, 0.1 * yb)                  # LeakyReLU(0.1)
        else:
            yb = jnp.maximum(yb, 0.0)                       # ReLU

    # Batched Gram matrix on the MXU: contract the lane (M) axis.
    xp = lax.dot_general(yb, yb, (((2,), (2,)), ((0,), (0,))),
                         preferred_element_type=jnp.float32)     # (Bt, D, D)

    # diag(xp) in both orientations via an iota mask (no in-kernel transpose);
    # identical to the reference's (x_pow2 * I) formulation.
    ii = lax.broadcasted_iota(jnp.int32, (D, D), 0)
    jj = lax.broadcasted_iota(jnp.int32, (D, D), 1)
    xp_diag = jnp.where(ii == jj, xp, 0.0)
    diag_col = jnp.sum(xp_diag, axis=2, keepdims=True)           # (Bt, D, 1)
    diag_row = jnp.sum(xp_diag, axis=1, keepdims=True)           # (Bt, 1, D)

    dcov = diag_col + diag_row - 2.0 * xp
    dcov = jnp.maximum(dcov, 0.0)
    dcov = jnp.sqrt(exp_t * dcov + 1e-5)

    rowsum = jnp.sum(dcov, axis=2, keepdims=True)                # (Bt, D, 1)
    colsum = jnp.sum(dcov, axis=1, keepdims=True)                # (Bt, 1, D)
    total = jnp.sum(rowsum, axis=1, keepdims=True)               # (Bt, 1, 1)

    inv_d = 1.0 / D
    inv_d2 = 1.0 / (D * D)
    out_ref[...] = dcov - rowsum * inv_d - colsum * inv_d + total * inv_d2


def bdc_pool(y3, exp_t, scale, shift, *, apply_affine, act="relu",
             batch_tile=None, tile_cap_bytes=16 << 20, vmem_limit_bytes=None):
    """y3: (B, D, M) activation, exp_t: (1, 1), scale/shift: (D, 1)."""
    B, D, M = y3.shape
    Bt = batch_tile if batch_tile is not None else _pick_batch_tile(
        B, M, D, tile_cap_bytes)
    grid = (B // Bt,)
    kern = functools.partial(_bdc_pool_kernel, apply_affine=apply_affine, act=act)
    return pl.pallas_call(
        kern,
        out_shape=jax.ShapeDtypeStruct((B, D, D), jnp.float32),
        grid=grid,
        in_specs=[
            pl.BlockSpec(memory_space=pltpu.MemorySpace.SMEM),   # exp(t) scalar
            pl.BlockSpec((D, 1), lambda b: (0, 0)),
            pl.BlockSpec((D, 1), lambda b: (0, 0)),
            pl.BlockSpec((Bt, D, M), lambda b: (b, 0, 0)),
        ],
        out_specs=pl.BlockSpec((Bt, D, D), lambda b: (b, 0, 0)),
        compiler_params=_cparams(("parallel",), vmem_limit_bytes),
    )(exp_t, scale, shift, y3)


# ----------------------------------------------------------------------------
# Module wrapper
# ----------------------------------------------------------------------------
class BDCPallas:
    """JAX/Pallas equivalent of mdistiller BDC module (forward only)."""

    def __init__(self, is_vec=True, input_dim=(8, 16, 16), dimension_reduction=4,
                 activate="relu", key=None):
        self.is_vec = is_vec
        self.dr = dimension_reduction
        self.activate = activate
        self.input_dim = input_dim[0]
        out_dim = self.dr if self.dr else self.input_dim
        self.output_dim = (out_dim * (out_dim + 1)) // 2 if is_vec else out_dim * out_dim
        # temperature = log(1 / (2*H*W)) * ones(1,1)  (buffer, not trained here)
        self.temperature = jnp.log(
            1.0 / (2 * input_dim[1] * input_dim[2]) * jnp.ones((1, 1), jnp.float32)
        ).astype(jnp.float32)
        self.conv_w = None
        if self.dr is not None and self.dr != self.input_dim:
            # kaiming_normal_, mode='fan_out', nonlinearity='leaky_relu', a=0
            # -> gain = sqrt(2), fan_out = dr * 1 * 1
            std = float(np.sqrt(2.0 / self.dr))
            key = jax.random.PRNGKey(0) if key is None else key
            self.conv_w = std * jax.random.normal(
                key, (self.dr, self.input_dim), jnp.float32)
            self.bn_gamma = jnp.ones((self.dr, 1), jnp.float32)
            self.bn_beta = jnp.zeros((self.dr, 1), jnp.float32)
        # TODO(synk): running-mean/var updates (eval-mode BN) are not modeled;
        # forward uses training-mode batch statistics like the reference.

    def __call__(self, x):
        # x: NCHW (B, C, H, W).  Keep the natural (B, C, M) layout — no HBM
        # transpose pass; M = H*W sits on the lane axis everywhere.
        B, C, H, W = x.shape
        M = H * W
        x3 = x.reshape(B, C, M).astype(jnp.float32)
        exp_t = jnp.exp(self.temperature)                 # (1,1), one scalar exp

        tile_cap, vmem_limit = _vmem_caps()

        if self.conv_w is not None:
            D = self.dr
            y3, s, ss = conv1x1_with_stats(
                x3, self.conv_w, tile_cap_bytes=tile_cap,
                vmem_limit_bytes=vmem_limit)
            n = float(B * M)
            total_s = jnp.sum(s, axis=0)                  # (D, 1)
            total_ss = jnp.sum(ss, axis=0)                # (D, 1)
            mean = total_s / n
            var = jnp.maximum(total_ss / n - mean * mean, 0.0)   # biased (BN train)
            rstd = lax.rsqrt(var + 1e-5)
            scale = self.bn_gamma * rstd                  # (D, 1)
            shift = self.bn_beta - mean * scale           # (D, 1)
            pooled = bdc_pool(y3, exp_t, scale, shift, apply_affine=True,
                              act=self.activate, tile_cap_bytes=tile_cap,
                              vmem_limit_bytes=vmem_limit)
        else:
            D = C
            ones = jnp.ones((D, 1), jnp.float32)
            zeros = jnp.zeros((D, 1), jnp.float32)
            pooled = bdc_pool(x3, exp_t, ones, zeros, apply_affine=False,
                              act=self.activate, tile_cap_bytes=tile_cap,
                              vmem_limit_bytes=vmem_limit)

        flat = pooled.reshape(B, D * D)
        if self.is_vec:
            # Triuvec: flat 1-D lane-axis take (cheaper than a 2-D gather).
            iu_r, iu_c = np.triu_indices(D)
            idx = jnp.asarray(iu_r * D + iu_c, dtype=jnp.int32)
            return jnp.take(flat, idx, axis=1)
        return flat


# ----------------------------------------------------------------------------
# Pure-JAX reference for validation
# ----------------------------------------------------------------------------
def reference_forward(x, mod: BDCPallas):
    B, C, H, W = x.shape
    x3 = x.reshape(B, C, H * W).astype(jnp.float32)
    if mod.conv_w is not None:
        y = jnp.einsum("oc,bcm->bom", mod.conv_w, x3,
                       precision=lax.Precision.HIGHEST)
        mean = jnp.mean(y, axis=(0, 2), keepdims=True)
        var = jnp.mean((y - mean) ** 2, axis=(0, 2), keepdims=True)
        y = (y - mean) / jnp.sqrt(var + 1e-5)
        y = y * mod.bn_gamma.reshape(1, -1, 1) + mod.bn_beta.reshape(1, -1, 1)
        if mod.activate == "leaky_relu":
            x3 = jnp.where(y > 0, y, 0.1 * y)
        else:
            x3 = jnp.maximum(y, 0.0)
    d = x3.shape[1]
    xp = jnp.einsum("bdm,bem->bde", x3, x3, precision=lax.Precision.HIGHEST)
    diag = jnp.diagonal(xp, axis1=1, axis2=2)                   # (B, D)
    dcov = diag[:, None, :] + diag[:, :, None] - 2.0 * xp
    dcov = jnp.maximum(dcov, 0.0)
    dcov = jnp.exp(mod.temperature[0, 0]) * dcov
    dcov = jnp.sqrt(dcov + 1e-5)
    rowsum = jnp.sum(dcov, axis=2, keepdims=True)
    colsum = jnp.sum(dcov, axis=1, keepdims=True)
    total = jnp.sum(dcov, axis=(1, 2), keepdims=True)
    t = dcov - rowsum / d - colsum / d + total / (d * d)
    if mod.is_vec:
        iu_r, iu_c = np.triu_indices(d)
        return t[:, iu_r, iu_c]
    return t.reshape(B, -1)


if __name__ == "__main__":
    key = jax.random.PRNGKey(0)
    kx, kw = jax.random.split(key)

    B, C, H, W = 2, 8, 16, 16
    DR = 4
    x = jax.random.normal(kx, (B, C, H, W), jnp.float32)

    # Path 1: with dimension-reduction conv + BN + ReLU.
    mod = BDCPallas(is_vec=True, input_dim=(C, H, W), dimension_reduction=DR,
                    activate="relu", key=kw)
    out = jax.block_until_ready(mod(x))
    ref = reference_forward(x, mod)
    assert out.shape == (B, mod.output_dim), (out.shape, mod.output_dim)
    np.testing.assert_allclose(np.asarray(out), np.asarray(ref),
                               rtol=5e-3, atol=5e-3)

    # Path 2: no dimension reduction (pool raw features).
    mod2 = BDCPallas(is_vec=True, input_dim=(C, H, W), dimension_reduction=None,
                     activate="relu", key=kw)
    out2 = jax.block_until_ready(mod2(x))
    ref2 = reference_forward(x, mod2)
    assert out2.shape == (B, mod2.output_dim), (out2.shape, mod2.output_dim)
    np.testing.assert_allclose(np.asarray(out2), np.asarray(ref2),
                               rtol=5e-3, atol=5e-3)

    print("KERNEL_OK")
</pallas_src>

<mosaic_0001>
module attributes {stable_mosaic.version = 11 : i64} {
  func.func @_conv_stats_kernel(%arg0: i32, %arg1: i32, %arg2: memref<1x8x256xf32, #tpu.memory_space<vmem>>, %arg3: memref<4x8xf32, #tpu.memory_space<vmem>>, %arg4: memref<1x4x256xf32, #tpu.memory_space<vmem>>, %arg5: memref<1x4x1xf32, #tpu.memory_space<vmem>>, %arg6: memref<1x4x1xf32, #tpu.memory_space<vmem>>) attributes {dimension_semantics = [#tpu.dimension_semantics<parallel>, #tpu.dimension_semantics<arbitrary>], iteration_bounds = array<i64: 2, 1>, scalar_prefetch = 0 : i64, scratch_operands = 0 : i64, tpu.core_type = #tpu.core_type<tc>, window_params = [{transform_indices = @transform_0, window_bounds = array<i64: 1, 8, 256>}, {pipeline_mode = #tpu.pipeline_mode<synchronous>, transform_indices = @transform_1, window_bounds = array<i64: 4, 8>}, {transform_indices = @transform_2, window_bounds = array<i64: 1, 4, 256>}, {transform_indices = @transform_3, window_bounds = array<i64: 1, 4, 1>}, {transform_indices = @transform_4, window_bounds = array<i64: 1, 4, 1>}]} {
    %c0_i32 = arith.constant 0 : i32
    %0 = arith.cmpi eq, %arg1, %c0_i32 : i32
    %1 = arith.extui %0 : i1 to i32
    %c0_i32_0 = arith.constant 0 : i32
    %2 = arith.cmpi ne, %1, %c0_i32_0 : i32
    scf.if %2 {
      %cst_22 = arith.constant 0.000000e+00 : f32
      %27 = vector.broadcast %cst_22 : f32 to vector<4x1xf32>
      %c0_23 = arith.constant 0 : index
      %c0_24 = arith.constant 0 : index
      %c0_25 = arith.constant 0 : index
      %28 = vector.load %arg5[%c0_23, %c0_24, %c0_25] : memref<1x4x1xf32, #tpu.memory_space<vmem>>, vector<1x4x1xf32>
      %29 = vector.shape_cast %28 : vector<1x4x1xf32> to vector<4x1xf32>
      %30 = vector.shape_cast %27 : vector<4x1xf32> to vector<1x4x1xf32>
      tpu.vector_store %arg5[%c0_23, %c0_24, %c0_25], %30 {strides = array<i32>} : memref<1x4x1xf32, #tpu.memory_space<vmem>>, vector<1x4x1xf32>,
      %cst_26 = arith.constant 0.000000e+00 : f32
      %31 = vector.broadcast %cst_26 : f32 to vector<4x1xf32>
      %c0_27 = arith.constant 0 : index
      %c0_28 = arith.constant 0 : index
      %c0_29 = arith.constant 0 : index
      %32 = vector.load %arg6[%c0_27, %c0_28, %c0_29] : memref<1x4x1xf32, #tpu.memory_space<vmem>>, vector<1x4x1xf32>
      %33 = vector.shape_cast %32 : vector<1x4x1xf32> to vector<4x1xf32>
      %34 = vector.shape_cast %31 : vector<4x1xf32> to vector<1x4x1xf32>
      tpu.vector_store %arg6[%c0_27, %c0_28, %c0_29], %34 {strides = array<i32>} : memref<1x4x1xf32, #tpu.memory_space<vmem>>, vector<1x4x1xf32>,
    } else {
    }
    %c0 = arith.constant 0 : index
    %c0_1 = arith.constant 0 : index
    %3 = vector.load %arg3[%c0, %c0_1] : memref<4x8xf32, #tpu.memory_space<vmem>>, vector<4x8xf32>
    %c0_2 = arith.constant 0 : index
    %c0_3 = arith.constant 0 : index
    %c0_4 = arith.constant 0 : index
    %4 = vector.load %arg2[%c0_2, %c0_3, %c0_4] : memref<1x8x256xf32, #tpu.memory_space<vmem>>, vector<1x8x256xf32>
    %5 = vector.shape_cast %4 : vector<1x8x256xf32> to vector<8x256xf32>
    %cst = arith.constant dense<0.000000e+00> : vector<4x256xf32>
    %6 = tpu.matmul %3, %5, %cst {dimension_numbers = #tpu.dot_dimension_numbers<[1], [0], [0], [1], [0, 0, 1, 1], [], []>} : vector<4x8xf32>, vector<8x256xf32>, vector<4x256xf32> -> vector<4x256xf32>
    %c0_5 = arith.constant 0 : index
    %c0_6 = arith.constant 0 : index
    %c0_7 = arith.constant 0 : index
    %7 = vector.load %arg4[%c0_5, %c0_6, %c0_7] : memref<1x4x256xf32, #tpu.memory_space<vmem>>, vector<1x4x256xf32>
    %8 = vector.shape_cast %7 : vector<1x4x256xf32> to vector<4x256xf32>
    %9 = vector.shape_cast %6 : vector<4x256xf32> to vector<1x4x256xf32>
    tpu.vector_store %arg4[%c0_5, %c0_6, %c0_7], %9 {strides = array<i32>} : memref<1x4x256xf32, #tpu.memory_space<vmem>>, vector<1x4x256xf32>,
    %c0_8 = arith.constant 0 : index
    %c0_9 = arith.constant 0 : index
    %c0_10 = arith.constant 0 : index
    %10 = vector.load %arg5[%c0_8, %c0_9, %c0_10] : memref<1x4x1xf32, #tpu.memory_space<vmem>>, vector<1x4x1xf32>
    %11 = vector.shape_cast %10 : vector<1x4x1xf32> to vector<4x1xf32>
    %cst_11 = arith.constant dense<0.000000e+00> : vector<4xf32>
    %12 = vector.multi_reduction <add>, %6, %cst_11 [1] : vector<4x256xf32> to vector<4xf32>
    %13 = vector.shape_cast %12 : vector<4xf32> to vector<4x1xf32>
    %14 = arith.addf %11, %13 : vector<4x1xf32>
    %c0_12 = arith.constant 0 : index
    %c0_13 = arith.constant 0 : index
    %c0_14 = arith.constant 0 : index
    %15 = vector.load %arg5[%c0_12, %c0_13, %c0_14] : memref<1x4x1xf32, #tpu.memory_space<vmem>>, vector<1x4x1xf32>
    %16 = vector.shape_cast %15 : vector<1x4x1xf32> to vector<4x1xf32>
    %17 = vector.shape_cast %14 : vector<4x1xf32> to vector<1x4x1xf32>
    tpu.vector_store %arg5[%c0_12, %c0_13, %c0_14], %17 {strides = array<i32>} : memref<1x4x1xf32, #tpu.memory_space<vmem>>, vector<1x4x1xf32>,
    %c0_15 = arith.constant 0 : index
    %c0_16 = arith.constant 0 : index
    %c0_17 = arith.constant 0 : index
    %18 = vector.load %arg6[%c0_15, %c0_16, %c0_17] : memref<1x4x1xf32, #tpu.memory_space<vmem>>, vector<1x4x1xf32>
    %19 = vector.shape_cast %18 : vector<1x4x1xf32> to vector<4x1xf32>
    %20 = arith.mulf %6, %6 : vector<4x256xf32>
    %cst_18 = arith.constant dense<0.000000e+00> : vector<4xf32>
    %21 = vector.multi_reduction <add>, %20, %cst_18 [1] : vector<4x256xf32> to vector<4xf32>
    %22 = vector.shape_cast %21 : vector<4xf32> to vector<4x1xf32>
    %23 = arith.addf %19, %22 : vector<4x1xf32>
    %c0_19 = arith.constant 0 : index
    %c0_20 = arith.constant 0 : index
    %c0_21 = arith.constant 0 : index
    %24 = vector.load %arg6[%c0_19, %c0_20, %c0_21] : memref<1x4x1xf32, #tpu.memory_space<vmem>>, vector<1x4x1xf32>
    %25 = vector.shape_cast %24 : vector<1x4x1xf32> to vector<4x1xf32>
    %26 = vector.shape_cast %23 : vector<4x1xf32> to vector<1x4x1xf32>
    tpu.vector_store %arg6[%c0_19, %c0_20, %c0_21], %26 {strides = array<i32>} : memref<1x4x1xf32, #tpu.memory_space<vmem>>, vector<1x4x1xf32>,
    return
  }
  func.func @transform_0(%arg0: i32, %arg1: i32) -> (i32, i32, i32) {
    %c0_i32 = arith.constant 0 : i32
    %c0_i32_0 = arith.constant 0 : i32
    return %arg0, %c0_i32, %arg1 : i32, i32, i32
  }
  func.func @transform_1(%arg0: i32, %arg1: i32) -> (i32, i32) {
    %c0_i32 = arith.constant 0 : i32
    %c0_i32_0 = arith.constant 0 : i32
    %c0_i32_1 = arith.constant 0 : i32
    return %c0_i32, %c0_i32_0 : i32, i32
  }
  func.func @transform_2(%arg0: i32, %arg1: i32) -> (i32, i32, i32) {
    %c0_i32 = arith.constant 0 : i32
    %c0_i32_0 = arith.constant 0 : i32
    return %arg0, %c0_i32, %arg1 : i32, i32, i32
  }
  func.func @transform_3(%arg0: i32, %arg1: i32) -> (i32, i32, i32) {
    %c0_i32 = arith.constant 0 : i32
    %c0_i32_0 = arith.constant 0 : i32
    %c0_i32_1 = arith.constant 0 : i32
    return %arg0, %c0_i32, %c0_i32_0 : i32, i32, i32
  }
  func.func @transform_4(%arg0: i32, %arg1: i32) -> (i32, i32, i32) {
    %c0_i32 = arith.constant 0 : i32
    %c0_i32_0 = arith.constant 0 : i32
    %c0_i32_1 = arith.constant 0 : i32
    return %arg0, %c0_i32, %c0_i32_0 : i32, i32, i32
  }
}

</mosaic_0001>

<bundles_post_ra>
// kernel: tpu_custom_call.1
= control target key start
LH: loop header
LB: loop body
LE: loop exit
PB: predicated region body
PF: predicated region fallthrough
CT: control target
= control target key end

     0   :  { %10 = vsyncpa [#allocation3], 0  ;;  %s976_s0 = inlined_call_operand.hbm [shape: f32[2,8,256], index: 0, kind: input, shape index: {}]   ;;  %s977_s1 = inlined_call_operand.hbm [shape: f32[4,8], index: 1, kind: input, shape index: {}]   ;;  %s978_s2 = inlined_call_operand.hbm [shape: f32[2,4,256], index: 2, kind: output, shape index: {0}]   ;;  %s979_s3 = inlined_call_operand.vmem [shape: f32[2,4,1], index: 3, kind: output, shape index: {1}]   ;;  %s980_s4 = inlined_call_operand.vmem [shape: f32[2,4,1], index: 4, kind: output, shape index: {2}]  }
   0x1   :  { %12 = vsyncpa [#allocation3 + $0x1], 0 }
   0x2   :  { %13 = vsyncpa [#allocation6], 0 }
   0x3   :  { %14 = vsyncpa [#allocation4], 0 }
   0x4   :  { %16 = vsyncpa [#allocation4 + $0x1], 0  ;;  %s799_s15 = smov 0   ;;  %s801_s16 = smov 0  }
   0x5   :  { %s803_s17 = smov 0   ;;  %s805_s18 = smov 0  }
   0x6   :  { %s807_s19 = smov 0   ;;  %s809_s20 = smov 0  }
   0x7 LB: > { %s527_s21 = sadd.s32 4294967295, %s770_s20   ;;  %s528_s22 = sadd.s32 4294967294, %s770_s20   ;;  %s770_s20 = sphi %s809_s20, %s22_s20   ;;  %s766_s19 = sphi %s807_s19, %s992_s19   ;;  %s762_s18 = sphi %s805_s18, %s991_s18   ;;  %s758_s17 = sphi %s803_s17, %s990_s17   ;;  %s754_s16 = sphi %s801_s16, %s989_s16   ;;  %s750_s15 = sphi %s799_s15, %s988_s15  }
   0x8   : > { %p56_p0 = scmp.ne.s32.totalorder %s754_s16, %s750_s15  ;;  %p833_p1 = scmp.eq.s32.totalorder %s527_s21, 0 }
   0x9   : > { %p837_p2 = scmp.eq.s32.totalorder %s527_s21, 1  ;;  %p109_p3 = scmp.eq.s32.totalorder %s528_s22, 1 }
   0xa   : > { %p843_p4 = por %p833_p1, %p56_p0  ;;  %p529_p5 = scmp.ge.s32.totalorder %s770_s20, 1 }
   0xb   : > { %p848_p6 = por %p109_p3, %p56_p0  ;;  %p168_p7 = scmp.lt.s32.totalorder %s770_s20, 3 }
   0xc   : > { %s180_s29 = sshll.u32 %s977_s1, 4  ;;  %p531_p9 = scmp.ge.s32.totalorder %s770_s20, 2  ;;  %s181_s29 = int_to_ptr.hbm [resolvable:$true] %s180_s29 }
   0xd   : > { %p856_p8 = pnand %p529_p5, %p168_p7  ;;  %s772_s5 = smov [#allocation5]  }
   0xe   : > { %s182_s6 = sshll.u32 %s772_s5, 4  ;;  %s34_s7 = sadd.s32 1, %s766_s19  ;;  %s183_s6 = int_to_ptr.vmem [resolvable:$true] %s182_s6 }
   0xf   : > { %p558_p10 = pneg %p856_p8  ;;  %p36_p12 = scmp.ge.s32.totalorder %s34_s7, 2 }
  0x10   : > { %s43_s8 = sadd.s32 1, %s758_s17  ;;  %p50_p13 = scmp.ne.s32.totalorder %s758_s17, %s754_s16 }
  0x11   : > { %p559_p11 = pnand %p558_p10, %p833_p1  ;;  %p51_p0 = scmp.eq.s32.totalorder %s770_s20, 0 }
  0x12   : > { %s994_s7 = smov (%p36_p12, %s34_s7), 0  ;;  %p878_p5 = por %p837_p2, %p50_p13 }
  0x13   : > { %561 = dma.hbm_to_vmem [thread:$0]  (!%p559_p11), %s181_s29, 64, %s183_s6, [#allocation6]  }
  0x14   : > { %p872_p3 = por %p51_p0, %p50_p13  ;;  %s38_s11 = ssub.s32 %s766_s19, %s994_s7 }
  0x15   : > { %p571_p7 = scmp.lt.s32.totalorder %s770_s20, 2  ;;  %p41_p10 = scmp.eq.s32.totalorder %s38_s11, 0 }
  0x16   : > { %s193_s12 = sand.u32 1, %s758_s17   ;;  %s548_s21 = sshll.u32 %s766_s19, 4 }
  0x17   : > { %s532_s13 = sshll.u32 %s193_s12, 4  ;;  %s204_s28 = scalar_lea.hbm %s976_s0, %s548_s21 }
  0x18   : > { %s887_s14 = scalar_select %p41_p10, %s758_s17, %s43_s8  }
  0x19   : > { %s197_s29 = scalar_lea.vmem [#allocation2], %s532_s13  ;;  %s206_s24 = sshll.u32 %s204_s28, 4  ;;  %s207_s24 = int_to_ptr.hbm [resolvable:$true] %s206_s24 }
  0x1a   : > { %s208_s5 = sshll.u32 %s197_s29, 4  ;;  %p563_p2 = pnand %p571_p7, %p872_p3  ;;  %s209_s5 = int_to_ptr.vmem [resolvable:$true] %s208_s5 }
  0x1b   : > { %s194_s6 = scalar_lea.sflag [#allocation3], %s193_s12  ;;  %217 = sbr.rel (%p856_p8) target bundleno = 293 (0x125), region = 28 }
  0x1c   : > { %565 = dma.hbm_to_vmem [thread:$0]  (!%p563_p2), %s207_s24, 256, %s209_s5, %s194_s6  }
  0x1d   : > { %s898_s8 = sand.u32 (!%p856_p8), 1, %s754_s16  }
  0x1e   : > { %s536_s11 = sshll.u32 (!%p856_p8), %s898_s8, 4  ;;  %s220_s21 = scalar_lea.sflag (!%p856_p8), [#allocation3], %s898_s8 }
  0x1f   : > { %s223_s13 = scalar_lea.vmem (!%p856_p8), [#allocation2], %s536_s11 }
  0x20   : > { %737 = dma.done.wait (%p843_p4), %s220_s21, 256  }
  0x21   : > { %739 = vsyncadd (%p843_p4), %s220_s21, 4294967040 }
  0x22   : > { %741 = dma.done.wait (%p833_p1), [#allocation6], 64  }
  0x23   : > { %743 = vsyncadd (%p833_p1), [#allocation6], 4294967232  ;;  %vm282_vm0 = vcmask 64512   ;;  %v280_v0 = vld [vmem:[%s223_s13] sm:$0xff]  ;;  %v281_v1 = vld [vmem:[%s223_s13 + $0x8] sm:$0xff]  ;;  %p264_p8 = scmp.lt.s32.totalorder %s762_s18, 1 }
  0x24   : > { %v279_v2 = vld [vmem:[#allocation5] sm:$0xf]  ;;  %301 = vmatpush.msra.mxu0 %v280_v0  ;;  %321 = vmatpush.msra.mxu1 %v281_v1  ;;  %vm276_vm1 = vcmask 3072   ;;  %v773_v3 = vmov 0.0   ;;  %s538_s29 = sshll.u32 %s898_s8, 3  ;;  %vm329_vm2 = vcmask 1043456  }
  0x25   : > { %541 = vmatmul.msk.f32.vlgmr.msra.gmra.mxu0 %vm282_vm0, %v279_v2  ;;  %542 = vmatmul.msk.f32.vlgmr.msra.gmra.mxu1 %vm282_vm0, %v279_v2  ;;  %s265_s25 = scalar_select %p264_p8, %s762_s18, 1 }
  0x26   : > { %s549_s5 = sshll.u32 %s762_s18, 3  ;;  %s249_s21 = scalar_lea.vmem [#allocation7], %s538_s29 }
  0x27   : > { %s539_s30 = sshll.u32 %s265_s25, 2  ;;  %s374_s11 = scalar_lea.hbm %s978_s2, %s549_s5 }
  0x28   : > { %s915_s23 = scalar_lea.vmem %s979_s3, %s539_s30  ;;  %s922_s28 = scalar_lea.vmem %s980_s4, %s539_s30 }
  0x29   : > { %277 = vst.msk [vmem:[%s915_s23] sm:$0xf] %vm276_vm1, %v773_v3  ;;  %s376_s13 = sshll.u32 %s249_s21, 4  ;;  %s378_s25 = sshll.u32 %s374_s11, 4  ;;  %s377_s13 = int_to_ptr.vmem [resolvable:$true] %s376_s13  ;;  %s379_s25 = int_to_ptr.hbm [resolvable:$true] %s378_s25 }
  0x2a   : > { %278 = vst.msk [vmem:[%s922_s28] sm:$0xf] %vm276_vm1, %v773_v3  ;;  %s353_s18 = scalar_lea.sflag [#allocation4], %s898_s8  ;;  %s698_s30 = sshra.s32 %s379_s25, 4  ;;  %s699_s30 = int_to_ptr.hbm [resolvable:$true] %s698_s30 }
  0x2b   : > { %s700_s9 = scalar_lea.hbm %s699_s30, 8  ;;  %s704_s27 = scalar_lea.hbm %s978_s2, 16 }
  0x2c   : > { %p701_p1 = scmp.ne.s32.totalorder %s699_s30, %s700_s9  ;;  %p705_p12 = scmp.lt.s32.totalorder %s699_s30, %s978_s2 }
  0x2d   : > { %p706_p13 = scmp.lt.s32.totalorder %s704_s27, %s700_s9 }
  0x2e   : > { %p702_p4 = pnand %p701_p1, %p878_p5 }
  0x2f   : > { %p707_p0 = por %p706_p13, %p705_p12 }
  0x30   : > { %p703_p11 = pneg %p702_p4 }
  0x32   : > { %p708_p3 = pnand %p707_p0, %p703_p11 }
  0xa2   : > { %v303_v4 = vpop.f32.mrf.mxu0  ;;  %v323_v5 = vpop.f32.mrf.mxu1 }
  0xa3   : > { %v328_v6 = vrot.slane %v323_v5, 4  ;;  %v334_v7 = vsel %vm329_vm2, %v303_v4, 0.0  ;;  %v335_v8 = vsel %vm329_vm2, %v323_v5, 0.0  ;;  %v343_v11 = vmul.f32 %v303_v4, %v303_v4 }
  0xa4   : > { %v336_v10 = vadd.f32 %v335_v8, %v334_v7  ;;  %v344_v12 = vmul.f32 %v323_v5, %v323_v5 }
  0xa5   : > { %v330_v9 = vsel %vm329_vm2, %v303_v4, %v328_v6 }
  0xa6   : > { %332 = vst [vmem:[%s249_s21] sm:$0xff] %v330_v9  ;;  %337 = vadd.xlane.f32.xlu0 %v336_v10 }
  0xa7   : > { %711 = shalt.err (!%p708_p3)
}
  0xa8   : > { %556 = dma.vmem_to_hbm [thread:$0]  (%p878_p5), %s377_s13, 128, %s379_s25, %s353_s18   ;;  %v345_v13 = vsel %vm329_vm2, %v343_v11, 0.0  ;;  %v346_v14 = vsel %vm329_vm2, %v344_v12, 0.0  ;;  %v333_v16 = vld [vmem:[%s915_s23] sm:$0xf] }
  0xa9   : > { %v347_v15 = vadd.f32 %v346_v14, %v345_v13  ;;  %v342_v19 = vld [vmem:[%s922_s28] sm:$0xf] }
  0xae   : > { %348 = vadd.xlane.f32.xlu0 %v347_v15 }
 0x119   : > { %v338_v17 = vpop.xlane.xlu0 %337 }
 0x11a   : > { %v339_v18 = vadd.f32 %v338_v17, %v333_v16 }
 0x11c   : > { %341 = vst.msk [vmem:[%s915_s23] sm:$0xf] %vm276_vm1, %v339_v18 }
 0x121   : > { %v349_v20 = vpop.xlane.xlu0 %348 }
 0x122   : > { %v350_v21 = vadd.f32 %v349_v20, %v342_v19 }
 0x124   : > { %351 = vst.msk [vmem:[%s922_s28] sm:$0xf] %vm276_vm1, %v350_v21 }
 0x125 PF: > { %s396_s10 = sand.u32 1, %s750_s15   ;;  %p567_p5 = pnand %p531_p9, %p848_p6 }
 0x126   : > { %s397_s8 = scalar_lea.sflag [#allocation4], %s396_s10 }
 0x127   : > { %p568_p7 = pneg %p567_p5 }
 0x129   : > { %745 = dma.done.wait (%p568_p7), %s397_s8, 128  }
 0x12a   : > { %747 = vsyncadd (%p568_p7), %s397_s8, 4294967168  ;;  %s22_s20 = sadd.s32 1, %s770_s20   ;;  %s988_s15 = smov %s754_s16 }
 0x12b   : > { %p19_p10 = scmp.ge.s32.totalorder %s22_s20, 4   ;;  %s989_s16 = smov %s758_s17 }
 0x12c   : > { %s990_s17 = smov %s887_s14  ;;  %s991_s18 = smov %s766_s19 }
 0x12d   : > { %s992_s19 = smov %s994_s7  ;;  %21 = sbr.rel (!%p19_p10) target bundleno = 7 (0x7), region = 105 }
 0x132   :  { %417 = vsyncpa [#allocation3], 1 }
 0x133   :  { %419 = vsyncpa [#allocation3 + $0x1], 1 }
 0x134   :  { %420 = vsyncpa [#allocation6], 1 }
 0x135   :  { %421 = vsyncpa [#allocation4], 1 }
 0x136   :  { %423 = vsyncpa [#allocation4 + $0x1], 1 }

</bundles_post_ra>
